<compile_context>
chip_gen: v7x
topology: tpu7x:2x2x1
jax: 0.10.0
libtpu: 0.0.40
codegen_flags: <defaults>
</compile_context>

<pallas_src>
import jax
import jax.numpy as jnp
from jax.experimental import pallas as pl
from jax.experimental.pallas import tpu as pltpu

NUM_TYPES = 3            # three node types
NUM_NODES = 10           # node_features = [10, 10, 10]
IN_CH = 4                # node_input_channels = [4, 4, 4]
OUT_CH = 2               # output_channels = [2, 2, 2]

TIN = NUM_TYPES * IN_CH      # 12 block-diagonal input channels
TOUT = NUM_TYPES * OUT_CH    # 6  block-diagonal output channels
ROWS = 32                    # 30 stacked nodes, padded to a multiple of 8 sublanes
LANE = 128                   # vreg lane width
HALF = LANE // 2             # 64: lane offset where the rolled neighbour-aggregate lands

# Weight-slab row offsets (all multiples of 8 sublanes).
WC1_BASE = 0                 # conv1 fused: W_self rows [0,12), W_neigh rows [64,76)
WC2_BASE = 128               # conv2 fused: W_self rows [128,134), W_neigh rows [192,198)
WL1_BASE = 256               # lin1 (block-diag 6x6 in the top-left of a 128x128 block)
WL2_BASE = 384               # lin2
B1_ROW = 512                 # lin1 bias row (cols >= 6 zero)
B2_ROW = 520                 # lin2 bias row
W_ROWS = 528                 # total slab rows (~270 KiB f32) -> one dense DMA, VMEM-resident


def _s2vnet2_kernel(x_ref, a_ref, w_ref, o_ref):
    x = x_ref[0]                                    # (32, 128) block-diag feats (cols >= 12 zero)
    a = a_ref[0]                                    # (32, 32)  block-diag dense adjacency

    wc1 = w_ref[WC1_BASE:WC2_BASE, :]               # (128,128) conv1 fused [W_self ; W_neigh@64]
    wc2 = w_ref[WC2_BASE:WL1_BASE, :]               # (128,128) conv2 fused
    wl1 = w_ref[WL1_BASE:WL2_BASE, :]               # (128,128) lin1
    wl2 = w_ref[WL2_BASE:B1_ROW, :]                 # (128,128) lin2
    b1 = w_ref[B1_ROW:B1_ROW + 1, :]                # (1,128)   lin1 bias
    b2 = w_ref[B2_ROW:B2_ROW + 1, :]                # (1,128)   lin2 bias

    # ---- conv1 : MultiS2V, self + neighbour fused into one K=128 dot -------------
    agg1 = jnp.dot(a, x, preferred_element_type=jnp.float32)          # (32,128)
    comb1 = x + pltpu.roll(agg1, HALF, axis=1)      # neigh features land in lanes [64,76)
    c1 = jnp.maximum(
        jnp.dot(comb1, wc1, preferred_element_type=jnp.float32), 0.0)  # (32,128), cols>=6 zero

    # ---- lin1 (kept 128 lanes wide so conv2's roll-fusion stays aligned) ---------
    h = jnp.dot(c1, wl1, preferred_element_type=jnp.float32) + b1      # (32,128)

    # ---- conv2 : MultiS2V ---------------------------------------------------------
    agg2 = jnp.dot(a, h, preferred_element_type=jnp.float32)           # (32,128)
    comb2 = h + pltpu.roll(agg2, HALF, axis=1)
    c2 = jnp.maximum(
        jnp.dot(comb2, wc2, preferred_element_type=jnp.float32), 0.0)  # (32,128)

    # ---- lin2 + sigmoid, single lane-dense unmasked store -------------------------
    o_ref[0] = jax.nn.sigmoid(
        jnp.dot(c2, wl2, preferred_element_type=jnp.float32) + b2)     # (32,128)


def pack_weight_slab(params):
    """Pack all per-type weights/biases into ONE lane-dense (528,128) f32 slab.

    Call once at model init (constant w.r.t. inputs); do NOT re-run per forward.
    """
    w = jnp.zeros((W_ROWS, LANE), jnp.float32)
    for t in range(NUM_TYPES):
        ci, co = t * IN_CH, t * OUT_CH
        # conv1 fused: W_self rows [0,12), W_neigh rows [64,76)
        w = w.at[WC1_BASE + ci:WC1_BASE + ci + IN_CH, co:co + OUT_CH].set(params["w1a"][t])
        w = w.at[WC1_BASE + HALF + ci:WC1_BASE + HALF + ci + IN_CH, co:co + OUT_CH].set(params["w2a"][t])
        # conv2 fused: W_self rows [128,134), W_neigh rows [192,198)
        w = w.at[WC2_BASE + co:WC2_BASE + co + OUT_CH, co:co + OUT_CH].set(params["w1b"][t])
        w = w.at[WC2_BASE + HALF + co:WC2_BASE + HALF + co + OUT_CH, co:co + OUT_CH].set(params["w2b"][t])
        # lin1 / lin2 (2x2 per-type blocks on the diagonal of the top-left 6x6)
        w = w.at[WL1_BASE + co:WL1_BASE + co + OUT_CH, co:co + OUT_CH].set(params["wl1"][t])
        w = w.at[WL2_BASE + co:WL2_BASE + co + OUT_CH, co:co + OUT_CH].set(params["wl2"][t])
        # biases
        w = w.at[B1_ROW, co:co + OUT_CH].set(params["bl1"][t, 0])
        w = w.at[B2_ROW, co:co + OUT_CH].set(params["bl2"][t, 0])
    return w


@jax.jit
def s2vnet2_forward(x, adj, w_slab):
    """x: (B,T,N,IN_CH) f32; adj: (B,T,N,N) f32 dense adjacency; w_slab: pack_weight_slab output."""
    B = x.shape[0]

    # Per-call, data-dependent packing only (weights are pre-packed at init):
    # block-diagonal features / adjacency per graph, zero-padded to 32 rows.
    x_pad = jnp.zeros((B, ROWS, LANE), jnp.float32)
    a_pad = jnp.zeros((B, ROWS, ROWS), jnp.float32)
    for t in range(NUM_TYPES):
        r, c = t * NUM_NODES, t * IN_CH
        x_pad = x_pad.at[:, r:r + NUM_NODES, c:c + IN_CH].set(x[:, t])
        a_pad = a_pad.at[:, r:r + NUM_NODES, r:r + NUM_NODES].set(adj[:, t])

    out_pad = pl.pallas_call(
        _s2vnet2_kernel,
        out_shape=jax.ShapeDtypeStruct((B, ROWS, LANE), jnp.float32),
        grid=(B,),
        in_specs=[
            pl.BlockSpec((1, ROWS, LANE), lambda b: (b, 0, 0)),   # per-graph features
            pl.BlockSpec((1, ROWS, ROWS), lambda b: (b, 0, 0)),   # per-graph adjacency
            pl.BlockSpec((W_ROWS, LANE), lambda b: (0, 0)),       # weights: resident, one DMA
        ],
        out_specs=pl.BlockSpec((1, ROWS, LANE), lambda b: (b, 0, 0)),
        compiler_params=pltpu.CompilerParams(
            dimension_semantics=("parallel",)),                   # shard batch across v7x's 2 TCs
    )(x_pad, a_pad, w_slab)

    # Extract the per-type (N, OUT_CH) diagonal blocks -> (B, T, N, OUT_CH).
    outs = [out_pad[:, t * NUM_NODES:(t + 1) * NUM_NODES,
                    t * OUT_CH:(t + 1) * OUT_CH] for t in range(NUM_TYPES)]
    return jnp.stack(outs, axis=1)


def _reference(x, adj, p):
    """Pure-JAX reference of the same forward pass (per-type, unpacked, batched)."""
    agg = jnp.einsum("btnm,btmc->btnc", adj, x)
    h = jax.nn.relu(jnp.einsum("btnc,tco->btno", x, p["w1a"])
                    + jnp.einsum("btnc,tco->btno", agg, p["w2a"]))
    h = jnp.einsum("btno,top->btnp", h, p["wl1"]) + p["bl1"]
    agg2 = jnp.einsum("btnm,btmo->btno", adj, h)
    h = jax.nn.relu(jnp.einsum("btno,top->btnp", h, p["w1b"])
                    + jnp.einsum("btno,top->btnp", agg2, p["w2b"]))
    h = jnp.einsum("btno,top->btnp", h, p["wl2"]) + p["bl2"]
    return jax.nn.sigmoid(h)


if __name__ == "__main__":
    key = jax.random.PRNGKey(0)
    keys = jax.random.split(key, 12)

    B = 4  # batch of graphs processed by ONE pallas_call

    # Node features per graph / type: (B, T, N, IN_CH)
    x = jax.random.normal(keys[0], (B, NUM_TYPES, NUM_NODES, IN_CH), dtype=jnp.float32)

    # Deterministic edge_index per graph / node type, then densify (row=target, col=source).
    E = 20
    src = jax.random.randint(keys[1], (B, NUM_TYPES, E), 0, NUM_NODES)
    dst = jax.random.randint(keys[2], (B, NUM_TYPES, E), 0, NUM_NODES)
    adj = jnp.zeros((B, NUM_TYPES, NUM_NODES, NUM_NODES), dtype=jnp.float32)
    for b in range(B):
        for t in range(NUM_TYPES):
            adj = adj.at[b, t, dst[b, t], src[b, t]].set(1.0)

    def winit(k, shape, scale=0.3):
        return scale * jax.random.normal(k, shape, dtype=jnp.float32)

    # Weights stored as (in, out); PyTorch nn.Linear uses (out, in) + transpose — equivalent.
    params = {
        "w1a": winit(keys[3], (NUM_TYPES, IN_CH, OUT_CH)),    # conv1 W_self
        "w2a": winit(keys[4], (NUM_TYPES, IN_CH, OUT_CH)),    # conv1 W_neigh
        "wl1": winit(keys[5], (NUM_TYPES, OUT_CH, OUT_CH)),   # lin1
        "bl1": winit(keys[6], (NUM_TYPES, 1, OUT_CH)),
        "w1b": winit(keys[7], (NUM_TYPES, OUT_CH, OUT_CH)),   # conv2 W_self
        "w2b": winit(keys[8], (NUM_TYPES, OUT_CH, OUT_CH)),   # conv2 W_neigh
        "wl2": winit(keys[9], (NUM_TYPES, OUT_CH, OUT_CH)),   # lin2
        "bl2": winit(keys[10], (NUM_TYPES, 1, OUT_CH)),
    }

    # One-time, at "model init" — NOT inside the per-call forward.
    w_slab = pack_weight_slab(params)

    out = s2vnet2_forward(x, adj, w_slab)
    out = jax.block_until_ready(out)

    ref = _reference(x, adj, params)
    assert out.shape == (B, NUM_TYPES, NUM_NODES, OUT_CH)
    assert jnp.allclose(out, ref, atol=1e-5, rtol=1e-5), "mismatch vs pure-JAX reference"

    print("KERNEL_OK")
</pallas_src>

<mosaic_0001>
module attributes {stable_mosaic.version = 11 : i64} {
  func.func @_s2vnet2_kernel(%arg0: i32, %arg1: memref<1x32x128xf32, #tpu.memory_space<vmem>>, %arg2: memref<1x32x32xf32, #tpu.memory_space<vmem>>, %arg3: memref<528x128xf32, #tpu.memory_space<vmem>>, %arg4: memref<1x32x128xf32, #tpu.memory_space<vmem>>) attributes {dimension_semantics = [#tpu.dimension_semantics<parallel>], iteration_bounds = array<i64: 4>, scalar_prefetch = 0 : i64, scratch_operands = 0 : i64, tpu.core_type = #tpu.core_type<tc>, window_params = [{transform_indices = @transform_0, window_bounds = array<i64: 1, 32, 128>}, {transform_indices = @transform_1, window_bounds = array<i64: 1, 32, 32>}, {pipeline_mode = #tpu.pipeline_mode<synchronous>, transform_indices = @transform_2, window_bounds = array<i64: 528, 128>}, {transform_indices = @transform_3, window_bounds = array<i64: 1, 32, 128>}]} {
    %c0 = arith.constant 0 : index
    %c0_0 = arith.constant 0 : index
    %c0_1 = arith.constant 0 : index
    %0 = vector.load %arg1[%c0, %c0_0, %c0_1] : memref<1x32x128xf32, #tpu.memory_space<vmem>>, vector<1x32x128xf32>
    %1 = vector.shape_cast %0 : vector<1x32x128xf32> to vector<32x128xf32>
    %c0_2 = arith.constant 0 : index
    %c0_3 = arith.constant 0 : index
    %c0_4 = arith.constant 0 : index
    %2 = vector.load %arg2[%c0_2, %c0_3, %c0_4] : memref<1x32x32xf32, #tpu.memory_space<vmem>>, vector<1x32x32xf32>
    %3 = vector.shape_cast %2 : vector<1x32x32xf32> to vector<32x32xf32>
    %c0_5 = arith.constant 0 : index
    %c0_6 = arith.constant 0 : index
    %4 = vector.load %arg3[%c0_5, %c0_6] : memref<528x128xf32, #tpu.memory_space<vmem>>, vector<128x128xf32>
    %c128 = arith.constant 128 : index
    %c0_7 = arith.constant 0 : index
    %5 = vector.load %arg3[%c128, %c0_7] : memref<528x128xf32, #tpu.memory_space<vmem>>, vector<128x128xf32>
    %c256 = arith.constant 256 : index
    %c0_8 = arith.constant 0 : index
    %6 = vector.load %arg3[%c256, %c0_8] : memref<528x128xf32, #tpu.memory_space<vmem>>, vector<128x128xf32>
    %c384 = arith.constant 384 : index
    %c0_9 = arith.constant 0 : index
    %7 = vector.load %arg3[%c384, %c0_9] : memref<528x128xf32, #tpu.memory_space<vmem>>, vector<128x128xf32>
    %c512 = arith.constant 512 : index
    %c0_10 = arith.constant 0 : index
    %8 = vector.load %arg3[%c512, %c0_10] : memref<528x128xf32, #tpu.memory_space<vmem>>, vector<1x128xf32>
    %c520 = arith.constant 520 : index
    %c0_11 = arith.constant 0 : index
    %9 = vector.load %arg3[%c520, %c0_11] : memref<528x128xf32, #tpu.memory_space<vmem>>, vector<1x128xf32>
    %cst = arith.constant dense<0.000000e+00> : vector<32x128xf32>
    %10 = tpu.matmul %3, %1, %cst {dimension_numbers = #tpu.dot_dimension_numbers<[1], [0], [0], [1], [0, 0, 1, 1], [], []>} : vector<32x32xf32>, vector<32x128xf32>, vector<32x128xf32> -> vector<32x128xf32>
    %c64_i32 = arith.constant 64 : i32
    %11 = tpu.dynamic_rotate %10 by %c64_i32 dim 1 : vector<32x128xf32>, i32 -> vector<32x128xf32>
    %12 = arith.addf %1, %11 : vector<32x128xf32>
    %cst_12 = arith.constant dense<0.000000e+00> : vector<32x128xf32>
    %13 = tpu.matmul %12, %4, %cst_12 {dimension_numbers = #tpu.dot_dimension_numbers<[1], [0], [0], [1], [0, 0, 1, 1], [], []>} : vector<32x128xf32>, vector<128x128xf32>, vector<32x128xf32> -> vector<32x128xf32>
    %cst_13 = arith.constant 0.000000e+00 : f32
    %14 = vector.broadcast %cst_13 : f32 to vector<32x128xf32>
    %15 = arith.maximumf %13, %14 : vector<32x128xf32>
    %cst_14 = arith.constant dense<0.000000e+00> : vector<32x128xf32>
    %16 = tpu.matmul %15, %6, %cst_14 {dimension_numbers = #tpu.dot_dimension_numbers<[1], [0], [0], [1], [0, 0, 1, 1], [], []>} : vector<32x128xf32>, vector<128x128xf32>, vector<32x128xf32> -> vector<32x128xf32>
    %17 = vector.broadcast %8 : vector<1x128xf32> to vector<32x128xf32>
    %18 = arith.addf %16, %17 : vector<32x128xf32>
    %cst_15 = arith.constant dense<0.000000e+00> : vector<32x128xf32>
    %19 = tpu.matmul %3, %18, %cst_15 {dimension_numbers = #tpu.dot_dimension_numbers<[1], [0], [0], [1], [0, 0, 1, 1], [], []>} : vector<32x32xf32>, vector<32x128xf32>, vector<32x128xf32> -> vector<32x128xf32>
    %c64_i32_16 = arith.constant 64 : i32
    %20 = tpu.dynamic_rotate %19 by %c64_i32_16 dim 1 : vector<32x128xf32>, i32 -> vector<32x128xf32>
    %21 = arith.addf %18, %20 : vector<32x128xf32>
    %cst_17 = arith.constant dense<0.000000e+00> : vector<32x128xf32>
    %22 = tpu.matmul %21, %5, %cst_17 {dimension_numbers = #tpu.dot_dimension_numbers<[1], [0], [0], [1], [0, 0, 1, 1], [], []>} : vector<32x128xf32>, vector<128x128xf32>, vector<32x128xf32> -> vector<32x128xf32>
    %cst_18 = arith.constant 0.000000e+00 : f32
    %23 = vector.broadcast %cst_18 : f32 to vector<32x128xf32>
    %24 = arith.maximumf %22, %23 : vector<32x128xf32>
    %cst_19 = arith.constant dense<0.000000e+00> : vector<32x128xf32>
    %25 = tpu.matmul %24, %7, %cst_19 {dimension_numbers = #tpu.dot_dimension_numbers<[1], [0], [0], [1], [0, 0, 1, 1], [], []>} : vector<32x128xf32>, vector<128x128xf32>, vector<32x128xf32> -> vector<32x128xf32>
    %26 = vector.broadcast %9 : vector<1x128xf32> to vector<32x128xf32>
    %27 = arith.addf %25, %26 : vector<32x128xf32>
    %28 = arith.negf %27 : vector<32x128xf32>
    %29 = math.exp %28 : vector<32x128xf32>
    %cst_20 = arith.constant 1.000000e+00 : f32
    %30 = vector.broadcast %cst_20 : f32 to vector<32x128xf32>
    %31 = arith.addf %30, %29 : vector<32x128xf32>
    %32 = arith.divf %30, %31 : vector<32x128xf32>
    %c0_21 = arith.constant 0 : index
    %c0_22 = arith.constant 0 : index
    %c0_23 = arith.constant 0 : index
    %33 = vector.load %arg4[%c0_21, %c0_22, %c0_23] : memref<1x32x128xf32, #tpu.memory_space<vmem>>, vector<1x32x128xf32>
    %34 = vector.shape_cast %33 : vector<1x32x128xf32> to vector<32x128xf32>
    %35 = vector.shape_cast %32 : vector<32x128xf32> to vector<1x32x128xf32>
    tpu.vector_store %arg4[%c0_21, %c0_22, %c0_23], %35 {strides = array<i32>} : memref<1x32x128xf32, #tpu.memory_space<vmem>>, vector<1x32x128xf32>,
    return
  }
  func.func @transform_0(%arg0: i32) -> (i32, i32, i32) {
    %c0_i32 = arith.constant 0 : i32
    %c0_i32_0 = arith.constant 0 : i32
    %c0_i32_1 = arith.constant 0 : i32
    return %arg0, %c0_i32, %c0_i32_0 : i32, i32, i32
  }
  func.func @transform_1(%arg0: i32) -> (i32, i32, i32) {
    %c0_i32 = arith.constant 0 : i32
    %c0_i32_0 = arith.constant 0 : i32
    %c0_i32_1 = arith.constant 0 : i32
    return %arg0, %c0_i32, %c0_i32_0 : i32, i32, i32
  }
  func.func @transform_2(%arg0: i32) -> (i32, i32) {
    %c0_i32 = arith.constant 0 : i32
    %c0_i32_0 = arith.constant 0 : i32
    %c0_i32_1 = arith.constant 0 : i32
    return %c0_i32, %c0_i32_0 : i32, i32
  }
  func.func @transform_3(%arg0: i32) -> (i32, i32, i32) {
    %c0_i32 = arith.constant 0 : i32
    %c0_i32_0 = arith.constant 0 : i32
    %c0_i32_1 = arith.constant 0 : i32
    return %arg0, %c0_i32, %c0_i32_0 : i32, i32, i32
  }
}

</mosaic_0001>

<bundles_post_ra>
// kernel: s2vnet2_forward.1
= control target key start
LH: loop header
LB: loop body
LE: loop exit
PB: predicated region body
PF: predicated region fallthrough
CT: control target
= control target key end

     0   :  { %s1427_s12 = smov 0   ;;  %s1714_s0 = inlined_call_operand.vmem [shape: f32[4,32,128], index: 0, kind: input, shape index: {}]   ;;  %s1715_s1 = inlined_call_operand.vmem [shape: f32[4,32,32], index: 1, kind: input, shape index: {}]   ;;  %s1716_s2 = inlined_call_operand.vmem [shape: f32[528,128], index: 2, kind: input, shape index: {}]   ;;  %s1717_s3 = inlined_call_operand.vmem [shape: f32[4,32,128], index: 3, kind: output, shape index: {}]  }
   0x1 LB: > { %s923_s13 = sadd.s32 4294967295, %s1404_s12   ;;  %p927_p0 = scmp.ge.s32.totalorder %s1404_s12, 1  ;;  %s1404_s12 = sphi %s1427_s12, %s13_s12  }
   0x2   : > { %p147_p1 = scmp.lt.s32.totalorder %s1404_s12, 5 }
   0x4   : > { %p148_p2 = pnand %p927_p0, %p147_p1 }
   0x5   : > { %p176_p3 = scmp.lt.s32.totalorder (!%p148_p2), %s923_s13, 3  ;;  %vm265_vm0 = vcmask (!%p148_p2), 261120   ;;  %v199_v10 = vld [vmem:[%s1716_s2] sm:$0xff] (!%p148_p2)  ;;  %v200_v11 = vld [vmem:[%s1716_s2 + $0x8] sm:$0xff] (!%p148_p2)  ;;  %v201_v12 = vld [vmem:[%s1716_s2 + $0x10] sm:$0xff] (!%p148_p2)  ;;  %s1406_s15 = smov (!%p148_p2), 64  }
   0x6   : > { %151 = sbr.rel (%p148_p2) target bundleno = 1595 (0x63b), region = 32  ;;  %v1237_v13 = vpack.c.bf16 (!%p148_p2), %v200_v11, %v199_v10  ;;  %v202_v14 = vld [vmem:[%s1716_s2 + $0x18] sm:$0xff] (!%p148_p2)  ;;  %v203_v16 = vld [vmem:[%s1716_s2 + $0x20] sm:$0xff] (!%p148_p2)  ;;  %v204_v17 = vld [vmem:[%s1716_s2 + $0x28] sm:$0xff] (!%p148_p2) }
   0x7   : > { %v1241_v15 = vpack.c.bf16 (!%p148_p2), %v202_v14, %v201_v12  ;;  %v1245_v18 = vpack.c.bf16 (!%p148_p2), %v204_v17, %v203_v16  ;;  %v205_v19 = vld [vmem:[%s1716_s2 + $0x30] sm:$0xff] (!%p148_p2)  ;;  %v206_v20 = vld [vmem:[%s1716_s2 + $0x38] sm:$0xff] (!%p148_p2)  ;;  %v207_v22 = vld [vmem:[%s1716_s2 + $0x40] sm:$0xff] (!%p148_p2) }
   0x8   : > { %1238 = vmatprep.subr.bf16.mxu1 (!%p148_p2), %v1237_v13  ;;  %v1249_v21 = vpack.c.bf16 (!%p148_p2), %v206_v20, %v205_v19  ;;  %v208_v23 = vld [vmem:[%s1716_s2 + $0x48] sm:$0xff] (!%p148_p2)  ;;  %v209_v25 = vld [vmem:[%s1716_s2 + $0x50] sm:$0xff] (!%p148_p2)  ;;  %v210_v26 = vld [vmem:[%s1716_s2 + $0x58] sm:$0xff] (!%p148_p2) }
   0x9   : > { %1240 = vmatpush3.bf16.msra.mxu1 (!%p148_p2), %v1237_v13  ;;  %v1253_v24 = vpack.c.bf16 (!%p148_p2), %v208_v23, %v207_v22  ;;  %v1257_v27 = vpack.c.bf16 (!%p148_p2), %v210_v26, %v209_v25  ;;  %v211_v28 = vld [vmem:[%s1716_s2 + $0x60] sm:$0xff] (!%p148_p2)  ;;  %v212_v29 = vld [vmem:[%s1716_s2 + $0x68] sm:$0xff] (!%p148_p2)  ;;  %v213_v31 = vld [vmem:[%s1716_s2 + $0x70] sm:$0xff] (!%p148_p2) }
   0xa   : > { %1242 = vmatprep.subr.bf16.mxu1 (!%p148_p2), %v1241_v15  ;;  %v1261_v30 = vpack.c.bf16 (!%p148_p2), %v212_v29, %v211_v28  ;;  %v214_v32 = vld [vmem:[%s1716_s2 + $0x78] sm:$0xff] (!%p148_p2)  ;;  %v231_v34 = vld [vmem:[%s1716_s2 + $0x100] sm:$0xff] (!%p148_p2)  ;;  %v232_v35 = vld [vmem:[%s1716_s2 + $0x108] sm:$0xff] (!%p148_p2) }
   0xb   : > { %v1265_v33 = vpack.c.bf16 (!%p148_p2), %v214_v32, %v213_v31  ;;  %v233_v36 = vld [vmem:[%s1716_s2 + $0x110] sm:$0xff] (!%p148_p2)  ;;  %v1269_v38 = vpack.c.bf16 (!%p148_p2), %v232_v35, %v231_v34  ;;  %v234_v39 = vld [vmem:[%s1716_s2 + $0x118] sm:$0xff] (!%p148_p2)  ;;  %v235_v42 = vld [vmem:[%s1716_s2 + $0x120] sm:$0xff] (!%p148_p2) }
   0xc   : > { %v1273_v41 = vpack.c.bf16 (!%p148_p2), %v234_v39, %v233_v36  ;;  %v236_v43 = vld [vmem:[%s1716_s2 + $0x128] sm:$0xff] (!%p148_p2)  ;;  %v237_v47 = vld [vmem:[%s1716_s2 + $0x130] sm:$0xff] (!%p148_p2)  ;;  %v238_v48 = vld [vmem:[%s1716_s2 + $0x138] sm:$0xff] (!%p148_p2) }
   0xd   : > { %s1719_s13 = smov (!%p176_p3, %s923_s13), 3  ;;  %1244 = vmatpush3.bf16.msra.mxu1 %v1241_v15  ;;  %v1277_v45 = vpack.c.bf16 %v236_v43, %v235_v42  ;;  %v1281_v49 = vpack.c.bf16 %v238_v48, %v237_v47  ;;  %v239_v50 = vld [vmem:[%s1716_s2 + $0x140] sm:$0xff]  ;;  %v240_v51 = vld [vmem:[%s1716_s2 + $0x148] sm:$0xff]  ;;  %v241_v53 = vld [vmem:[%s1716_s2 + $0x150] sm:$0xff] }
   0xe   : > { %s1435_s14 = sshll.u32 %s1719_s13, 5  ;;  %1246 = vmatprep.subr.bf16.mxu1 %v1245_v18  ;;  %v1285_v52 = vpack.c.bf16 %v240_v51, %v239_v50  ;;  %v242_v54 = vld [vmem:[%s1716_s2 + $0x158] sm:$0xff]  ;;  %v243_v56 = vld [vmem:[%s1716_s2 + $0x160] sm:$0xff]  ;;  %v244_v57 = vld [vmem:[%s1716_s2 + $0x168] sm:$0xff] }
   0xf   : > { %s180_s17 = scalar_lea.vmem %s1714_s0, %s1435_s14  ;;  %s185_s20 = scalar_lea.vmem %s1715_s1, %s1435_s14  ;;  %v1289_v55 = vpack.c.bf16 %v242_v54, %v241_v53  ;;  %v1293_v58 = vpack.c.bf16 %v244_v57, %v243_v56  ;;  %v246_v11 = vld [vmem:[%s1716_s2 + $0x178] sm:$0xff]  ;;  %v938_v17 = vld [vmem:[%s1716_s2 + $0x200] ss:$0 sm:$0xff]  ;;  %v216_v29 = vld [vmem:[%s1716_s2 + $0x88] sm:$0xff] }
  0x10   : > { %v1441_v0 = vld [vmem:[%s180_s17] sm:$0xff]  ;;  %v1443_v1 = vld [vmem:[%s180_s17 + $0x8] sm:$0xff]  ;;  %v1445_v2 = vld [vmem:[%s180_s17 + $0x10] sm:$0xff]  ;;  %s190_s6 = scalar_lea.vmem %s1717_s3, %s1435_s14 }
  0x11   : > { %v1229_v3 = vpack.c.bf16 %v1443_v1, %v1441_v0  ;;  %v1453_v4 = vld [vmem:[%s180_s17 + $0x18] sm:$0xff]  ;;  %v1455_v5 = vld [vmem:[%s185_s20] sm:$0xff]  ;;  %v1461_v7 = vld [vmem:[%s185_s20 + $0x8] sm:$0xff]  ;;  %1248 = vmatpush3.bf16.msra.mxu1 %v1245_v18 }
  0x12   : > { %v1233_v6 = vpack.c.bf16 %v1453_v4, %v1445_v2  ;;  %1057 = vmatprep.mubr.msk.f32.mxu0 %vm265_vm0, %v1455_v5  ;;  %v1463_v8 = vld [vmem:[%s185_s20 + $0x10] sm:$0xff]  ;;  %v1469_v9 = vld [vmem:[%s185_s20 + $0x18] sm:$0xff]  ;;  %1250 = vmatprep.subr.bf16.mxu1 %v1249_v21  ;;  %v215_v28 = vld [vmem:[%s1716_s2 + $0x80] sm:$0xff] }
  0x13   : > { %1230 = vmatprep.subr.bf16.mxu0 %v1229_v3  ;;  %v1309_v31 = vpack.c.bf16 %v216_v29, %v215_v28  ;;  %v220_v32 = vld [vmem:[%s1716_s2 + $0xa8] sm:$0xff]  ;;  %v221_v34 = vld [vmem:[%s1716_s2 + $0xb0] sm:$0xff]  ;;  %v222_v35 = vld [vmem:[%s1716_s2 + $0xb8] sm:$0xff] }
  0x14   : > { %1232 = vmatpush3.bf16.msra.mxu0 %v1229_v3  ;;  %v1321_v36 = vpack.c.bf16 %v222_v35, %v221_v34  ;;  %v227_v43 = vld [vmem:[%s1716_s2 + $0xe0] sm:$0xff]  ;;  %v230_v47 = vld [vmem:[%s1716_s2 + $0xf8] sm:$0xff]  ;;  %v248_v50 = vld [vmem:[%s1716_s2 + $0x188] sm:$0xff] }
  0x15   : > { %1234 = vmatprep.subr.bf16.mxu0 %v1233_v6  ;;  %1252 = vmatpush3.bf16.msra.mxu1 %v1249_v21  ;;  %v249_v51 = vld [vmem:[%s1716_s2 + $0x190] sm:$0xff]  ;;  %v250_v53 = vld [vmem:[%s1716_s2 + $0x198] sm:$0xff]  ;;  %v252_v56 = vld [vmem:[%s1716_s2 + $0x1a8] sm:$0xff] }
  0x16   : > { %1254 = vmatprep.subr.bf16.mxu1 %v1253_v24  ;;  %v1345_v54 = vpack.c.bf16 %v250_v53, %v249_v51 }
  0x18   : > { %1236 = vmatpush3.bf16.msra.mxu0 %v1233_v6 }
  0x19   : > { %1256 = vmatpush3.bf16.msra.mxu1 %v1253_v24  ;;  %1270 = vmatprep.subr.bf16.mxu0 %v1269_v38 }
  0x1a   : > { %1258 = vmatprep.subr.bf16.mxu1 %v1257_v27 }
  0x1b   : > { %1058 = vmatmul.mubr.msk.f32.vlgmr.msra.gmra.mrb[0].mxu0 %vm265_vm0, %v1461_v7 }
  0x1c   : > { %1060 = vmatprep.mubr.msk.f32.mxu0 %vm265_vm0, %v1463_v8  ;;  %1272 = vmatpush3.bf16.msra.mxu0 %v1269_v38  ;;  %v224_v38 = vld [vmem:[%s1716_s2 + $0xc8] sm:$0xff] }
  0x1d   : > { %1260 = vmatpush3.bf16.msra.mxu1 %v1257_v27  ;;  %1274 = vmatprep.subr.bf16.mxu0 %v1273_v41 }
  0x1e   : > { %1262 = vmatprep.subr.bf16.mxu1 %v1261_v30 }
  0x1f   : > { %1061 = vmatmul.mubr.msk.f32.gmra.mrb[2].mxu0 %vm265_vm0, %v1469_v9 }
  0x20   : > { %1276 = vmatpush3.bf16.msra.mxu0 %v1273_v41  ;;  %v226_v41 = vld [vmem:[%s1716_s2 + $0xd8] sm:$0xff] }
  0x21   : > { %1264 = vmatpush3.bf16.msra.mxu1 %v1261_v30  ;;  %1278 = vmatprep.subr.bf16.mxu0 %v1277_v45  ;;  %v217_v30 = vld [vmem:[%s1716_s2 + $0x90] sm:$0xff] }
  0x22   : > { %1266 = vmatprep.subr.bf16.mxu1 %v1265_v33 }
  0x24   : > { %1280 = vmatpush3.bf16.msra.mxu0 %v1277_v45 }
  0x25   : > { %1268 = vmatpush3.bf16.msra.mxu1 %v1265_v33  ;;  %1282 = vmatprep.subr.bf16.mxu0 %v1281_v49 }
  0x28   : > { %1284 = vmatpush3.bf16.msra.mxu0 %v1281_v49  ;;  %v247_v49 = vld [vmem:[%s1716_s2 + $0x180] sm:$0xff] }
  0x29   : > { %1286 = vmatprep.subr.bf16.mxu0 %v1285_v52 }
  0x2c   : > { %1288 = vmatpush3.bf16.msra.mxu0 %v1285_v52  ;;  %v1341_v52 = vpack.c.bf16 %v248_v50, %v247_v49 }
  0x2d   : > { %1290 = vmatprep.subr.bf16.mxu0 %v1289_v55 }
  0x30   : > { %1292 = vmatpush3.bf16.msra.mxu0 %v1289_v55  ;;  %v251_v55 = vld [vmem:[%s1716_s2 + $0x1a0] sm:$0xff] }
  0x31   : > { %1294 = vmatprep.subr.bf16.mxu0 %v1293_v58 }
  0x34   : > { %1296 = vmatpush3.bf16.msra.mxu0 %v1293_v58 }
  0xee   : > { %v1059_v37 = vpop.f32.mrb[0].mxu0 }
  0xef   : > { %v344_v40 = vpop.f32.mrb[1].mxu0 }
  0xf0   : > { %363 = vrot.lane.b32.xlu0 %v344_v40, %s1406_s15  ;;  %v225_v40 = vld [vmem:[%s1716_s2 + $0xd0] sm:$0xff] }
  0xf1   : > { %v1329_v42 = vpack.c.bf16 %v226_v41, %v225_v40 }
  0xf2   : > { %v1062_v44 = vpop.f32.mrb[2].mxu0 }
  0xf3   : > { %v354_v46 = vpop.f32.mrb[3].mxu0 }
  0xf4   : > { %365 = vrot.lane.b32.xlu0 %v1059_v37, %s1406_s15  ;;  %367 = vrot.lane.b32.xlu1 %v354_v46, %s1406_s15  ;;  %v223_v37 = vld [vmem:[%s1716_s2 + $0xc0] sm:$0xff]  ;;  %v229_v46 = vld [vmem:[%s1716_s2 + $0xf0] sm:$0xff] }
  0xf5   : > { %v1325_v39 = vpack.c.bf16 %v224_v38, %v223_v37  ;;  %v1337_v48 = vpack.c.bf16 %v230_v47, %v229_v46 }
  0xf8   : > { %369 = vrot.lane.b32.xlu1 %v1062_v44, %s1406_s15  ;;  %v228_v44 = vld [vmem:[%s1716_s2 + $0xe8] sm:$0xff] }
  0xf9   : > { %v1333_v45 = vpack.c.bf16 %v228_v44, %v227_v43 }
 0x162   : > { %v364_v59 = vpop.permute.xlu0 %363 }
 0x163   : > { %v371_v60 = vadd.f32 %v364_v59, %v1441_v0  ;;  %v245_v0 = vld [vmem:[%s1716_s2 + $0x170] sm:$0xff]  ;;  %v1349_v59 = vpack.c.bf16 %v252_v56, %v251_v55 }
 0x165   : > { %1095 = vmatprep.mubr.f32.mxu1 %v371_v60  ;;  %v253_v60 = vld [vmem:[%s1716_s2 + $0x1b0] sm:$0xff] }
 0x166   : > { %v366_v61 = vpop.permute.xlu0 %365  ;;  %v368_v62 = vpop.permute.xlu1 %367 }
 0x167   : > { %v372_v63 = vadd.f32 %v366_v61, %v1443_v1  ;;  %v373_v3 = vadd.f32 %v368_v62, %v1445_v2  ;;  %v1297_v1 = vpack.c.bf16 %v246_v11, %v245_v0  ;;  %v254_v61 = vld [vmem:[%s1716_s2 + $0x1b8] sm:$0xff]  ;;  %v257_v11 = vld [vmem:[%s1716_s2 + $0x1d0] sm:$0xff] }
 0x169   : > { %1096 = vmatmul.mubr.f32.vlgmr.msra.gmra.mrb[0].mxu1 %v372_v63  ;;  %1298 = vmatprep.subr.bf16.mxu0 %v1297_v1 }
 0x16a   : > { %1098 = vmatprep.mubr.f32.mxu1 %v373_v3  ;;  %v370_v6 = vpop.permute.xlu1 %369  ;;  %1300 = vmatpush3.bf16.msra.mxu0 %v1297_v1  ;;  %v1353_v3 = vpack.c.bf16 %v254_v61, %v253_v60  ;;  %v258_v1 = vld [vmem:[%s1716_s2 + $0x1d8] sm:$0xff] }
 0x16b   : > { %v374_v10 = vadd.f32 %v370_v6, %v1453_v4  ;;  %1310 = vmatprep.subr.bf16.mxu0 %v1309_v31  ;;  %v255_v6 = vld [vmem:[%s1716_s2 + $0x1c0] sm:$0xff] }
 0x16d   : > { %1099 = vmatmul.mubr.f32.gmra.mrb[2].mxu1 %v374_v10  ;;  %v256_v10 = vld [vmem:[%s1716_s2 + $0x1c8] sm:$0xff] }
 0x16e   : > { %1147 = vmatprep.mubr.msk.f32.mxu1 %vm265_vm0, %v1455_v5  ;;  %v1357_v0 = vpack.c.bf16 %v256_v10, %v255_v6 }
 0x23c   : > { %v1097_v2 = vpop.f32.mrb[0].mxu1 }
 0x23d   : > { %v441_v12 = vpop.f32.mrb[1].mxu1  ;;  %v461_v14 = vmax.f32 %v1097_v2, 0.0  ;;  %v1361_v2 = vpack.c.bf16 %v258_v1, %v257_v11 }
 0x23e   : > { %v460_v13 = vmax.f32 %v441_v12, 0.0  ;;  %v259_v12 = vld [vmem:[%s1716_s2 + $0x1e0] sm:$0xff] }
 0x240   : > { %v1100_v4 = vpop.f32.mrb[2].mxu1  ;;  %1133 = vmatprep.mubr.f32.mxu0 %v460_v13  ;;  %v260_v13 = vld [vmem:[%s1716_s2 + $0x1e8] sm:$0xff] }
 0x241   : > { %v451_v15 = vpop.f32.mrb[3].mxu1  ;;  %1134 = vmatmul.mubr.f32.vlgmr.msra.gmra.mrb[4].mxu0 %v461_v14  ;;  %v463_v16 = vmax.f32 %v1100_v4, 0.0  ;;  %v1365_v14 = vpack.c.bf16 %v260_v13, %v259_v12 }
 0x242   : > { %v462_v5 = vmax.f32 %v451_v15, 0.0  ;;  %1312 = vmatpush3.bf16.msra.mxu0 %v1309_v31 }
 0x244   : > { %1136 = vmatprep.mubr.f32.mxu0 %v462_v5 }
 0x245   : > { %1137 = vmatmul.mubr.f32.gmra.mrb[6].mxu0 %v463_v16 }
 0x314   : > { %v1135_v18 = vpop.f32.mrb[4].mxu0 }
 0x315   : > { %v1582_v19 = vadd.f32 %v1135_v18, %v938_v17  ;;  %v534_v20 = vpop.f32.mrb[5].mxu0 }
 0x316   : > { %v1584_v21 = vadd.f32 %v938_v17, %v534_v20 }
 0x318   : > { %v1301_v22 = vpack.c.bf16 %v1582_v19, %v1584_v21  ;;  %v1138_v23 = vpop.f32.mrb[6].mxu0 }
 0x319   : > { %v1588_v24 = vadd.f32 %v1138_v23, %v938_v17  ;;  %v544_v25 = vpop.f32.mrb[7].mxu0  ;;  %v261_v23 = vld [vmem:[%s1716_s2 + $0x1f0] sm:$0xff] }
 0x31a   : > { %v1590_v26 = vadd.f32 %v938_v17, %v544_v25  ;;  %1302 = vmatprep.subr.bf16.mxu1 %v1301_v22 }
 0x31b   : > { %1304 = vmatpush3.bf16.msra.mxu1 %v1301_v22 }
 0x31c   : > { %v1305_v27 = vpack.c.bf16 %v1588_v24, %v1590_v26 }
 0x31e   : > { %1306 = vmatprep.subr.bf16.mxu1 %v1305_v27 }
 0x31f   : > { %1308 = vmatpush3.bf16.msra.mxu1 %v1305_v27 }
 0x320   : > { %1342 = vmatprep.subr.bf16.mxu1 %v1341_v52 }
 0x322   : > { %1148 = vmatmul.mubr.msk.f32.vlgmr.msra.gmra.mrb[4].mxu1 %vm265_vm0, %v1461_v7  ;;  %v218_v7 = vld [vmem:[%s1716_s2 + $0x98] sm:$0xff] }
 0x323   : > { %1150 = vmatprep.mubr.msk.f32.mxu1 %vm265_vm0, %v1463_v8  ;;  %v1313_v8 = vpack.c.bf16 %v218_v7, %v217_v30  ;;  %1344 = vmatpush3.bf16.msra.mxu1 %v1341_v52  ;;  %v943_v7 = vld [vmem:[%s1716_s2 + $0x208] ss:$0 sm:$0xff] }
 0x324   : > { %1346 = vmatprep.subr.bf16.mxu1 %v1345_v54 }
 0x325   : > { %1314 = vmatprep.subr.bf16.mxu0 %v1313_v8 }
 0x326   : > { %1151 = vmatmul.mubr.msk.f32.gmra.mrb[6].mxu1 %vm265_vm0, %v1469_v9  ;;  %v219_v9 = vld [vmem:[%s1716_s2 + $0xa0] sm:$0xff]  ;;  %1316 = vmatpush3.bf16.msra.mxu0 %v1313_v8 }
 0x327   : > { %v1317_v33 = vpack.c.bf16 %v220_v32, %v219_v9  ;;  %1348 = vmatpush3.bf16.msra.mxu1 %v1345_v54 }
 0x328   : > { %1350 = vmatprep.subr.bf16.mxu1 %v1349_v59 }
 0x329   : > { %1318 = vmatprep.subr.bf16.mxu0 %v1317_v33 }
 0x32a   : > { %1320 = vmatpush3.bf16.msra.mxu0 %v1317_v33 }
 0x32b   : > { %1322 = vmatprep.subr.bf16.mxu0 %v1321_v36  ;;  %1352 = vmatpush3.bf16.msra.mxu1 %v1349_v59 }
 0x32c   : > { %1354 = vmatprep.subr.bf16.mxu1 %v1353_v3 }
 0x32e   : > { %1324 = vmatpush3.bf16.msra.mxu0 %v1321_v36 }
 0x32f   : > { %1326 = vmatprep.subr.bf16.mxu0 %v1325_v39  ;;  %1356 = vmatpush3.bf16.msra.mxu1 %v1353_v3 }
 0x330   : > { %1358 = vmatprep.subr.bf16.mxu1 %v1357_v0 }
 0x332   : > { %1328 = vmatpush3.bf16.msra.mxu0 %v1325_v39 }
 0x333   : > { %1330 = vmatprep.subr.bf16.mxu0 %v1329_v42  ;;  %1360 = vmatpush3.bf16.msra.mxu1 %v1357_v0 }
 0x334   : > { %1362 = vmatprep.subr.bf16.mxu1 %v1361_v2 }
 0x336   : > { %1332 = vmatpush3.bf16.msra.mxu0 %v1329_v42 }
 0x337   : > { %1334 = vmatprep.subr.bf16.mxu0 %v1333_v45  ;;  %1364 = vmatpush3.bf16.msra.mxu1 %v1361_v2 }
 0x338   : > { %1366 = vmatprep.subr.bf16.mxu1 %v1365_v14 }
 0x33a   : > { %1336 = vmatpush3.bf16.msra.mxu0 %v1333_v45 }
 0x33b   : > { %1338 = vmatprep.subr.bf16.mxu0 %v1337_v48  ;;  %1368 = vmatpush3.bf16.msra.mxu1 %v1365_v14 }
 0x33e   : > { %1340 = vmatpush3.bf16.msra.mxu0 %v1337_v48 }
 0x3f5   : > { %v1149_v57 = vpop.f32.mrb[4].mxu1 }
 0x3f6   : > { %640 = vrot.lane.b32.xlu1 %v1149_v57, %s1406_s15  ;;  %v619_v58 = vpop.f32.mrb[5].mxu1 }
 0x3f7   : > { %638 = vrot.lane.b32.xlu0 %v619_v58, %s1406_s15 }
 0x3f9   : > { %v1152_v62 = vpop.f32.mrb[6].mxu1 }
 0x3fa   : > { %644 = vrot.lane.b32.xlu1 %v1152_v62, %s1406_s15  ;;  %v629_v63 = vpop.f32.mrb[7].mxu1 }
 0x3fb   : > { %642 = vrot.lane.b32.xlu0 %v629_v63, %s1406_s15 }
 0x468   : > { %v641_v4 = vpop.permute.xlu1 %640 }
 0x469   : > { %v639_v15 = vpop.permute.xlu0 %638  ;;  %v647_v16 = vadd.f32 %v641_v4, %v1582_v19 }
 0x46a   : > { %v646_v5 = vadd.f32 %v639_v15, %v1584_v21  ;;  %v262_v21 = vld [vmem:[%s1716_s2 + $0x1f8] sm:$0xff] }
 0x46b   : > { %v1369_v25 = vpack.c.bf16 %v262_v21, %v261_v23 }
 0x46c   : > { %1185 = vmatprep.mubr.f32.mxu0 %v646_v5  ;;  %v645_v17 = vpop.permute.xlu1 %644 }
 0x46d   : > { %1186 = vmatmul.mubr.f32.vlgmr.msra.gmra.mrb[8].mxu0 %v647_v16  ;;  %v643_v18 = vpop.permute.xlu0 %642  ;;  %v649_v22 = vadd.f32 %v645_v17, %v1588_v24  ;;  %1370 = vmatprep.subr.bf16.mxu1 %v1369_v25 }
 0x46e   : > { %v648_v20 = vadd.f32 %v643_v18, %v1590_v26  ;;  %1372 = vmatpush3.bf16.msra.mxu1 %v1369_v25 }
 0x470   : > { %1188 = vmatprep.mubr.f32.mxu0 %v648_v20 }
 0x471   : > { %1189 = vmatmul.mubr.f32.gmra.mrb[10].mxu0 %v649_v22 }
 0x540   : > { %v1187_v19 = vpop.f32.mrb[8].mxu0 }
 0x541   : > { %v716_v27 = vpop.f32.mrb[9].mxu0  ;;  %v736_v29 = vmax.f32 %v1187_v19, 0.0 }
 0x542   : > { %v735_v28 = vmax.f32 %v716_v27, 0.0 }
 0x544   : > { %v1190_v26 = vpop.f32.mrb[10].mxu0  ;;  %1223 = vmatprep.mubr.f32.mxu1 %v735_v28 }
 0x545   : > { %v726_v24 = vpop.f32.mrb[11].mxu0  ;;  %1224 = vmatmul.mubr.f32.vlgmr.msra.gmra.mrb[8].mxu1 %v736_v29  ;;  %v738_v31 = vmax.f32 %v1190_v26, 0.0 }
 0x546   : > { %v737_v30 = vmax.f32 %v726_v24, 0.0 }
 0x548   : > { %1226 = vmatprep.mubr.f32.mxu1 %v737_v30 }
 0x549   : > { %1227 = vmatmul.mubr.f32.gmra.mrb[10].mxu1 %v738_v31 }
 0x618   : > { %v1225_v8 = vpop.f32.mrb[8].mxu1 }
 0x619   : > { %v815_v9 = vadd.f32 %v1225_v8, %v943_v7  ;;  %v809_v32 = vpop.f32.mrb[9].mxu1 }
 0x61a   : > { %v810_v33 = vadd.f32 %v943_v7, %v809_v32 }
 0x61b   : > { %v945_v34 = vmul.f32 -1.442695, %v815_v9 }
 0x61c   : > { %v944_v35 = vmul.f32 -1.442695, %v810_v33  ;;  %v1228_v36 = vpop.f32.mrb[10].mxu1 }
 0x61d   : > { %1382 = vpow2.f32 %v945_v34  ;;  %v825_v37 = vadd.f32 %v1228_v36, %v943_v7  ;;  %v819_v38 = vpop.f32.mrb[11].mxu1 }
 0x61e   : > { %1384 = vpow2.f32 %v944_v35  ;;  %v820_v39 = vadd.f32 %v943_v7, %v819_v38 }
 0x61f   : > { %v947_v40 = vmul.f32 -1.442695, %v825_v37 }
 0x620   : > { %v946_v41 = vmul.f32 -1.442695, %v820_v39 }
 0x621   : > { %1386 = vpow2.f32 %v947_v40 }
 0x622   : > { %1388 = vpow2.f32 %v946_v41 }
 0x627   : > { %v1383_v42 = vpop.eup %1382 }
 0x628   : > { %v1385_v43 = vpop.eup %1384  ;;  %v841_v44 = vadd.f32 1.0, %v1383_v42 }
 0x629   : > { %v840_v45 = vadd.f32 1.0, %v1385_v43 }
 0x62a   : > { %1390 = vrcp.f32 %v841_v44 }
 0x62b   : > { %v1387_v46 = vpop.eup %1386  ;;  %1392 = vrcp.f32 %v840_v45 }
 0x62c   : > { %v1389_v47 = vpop.eup %1388  ;;  %v843_v48 = vadd.f32 1.0, %v1387_v46 }
 0x62d   : > { %v842_v49 = vadd.f32 1.0, %v1389_v47 }
 0x62e   : > { %1394 = vrcp.f32 %v843_v48 }
 0x62f   : > { %1396 = vrcp.f32 %v842_v49 }
 0x634   : > { %v1391_v50 = vpop.eup %1390 }
 0x635   : > { %v1393_v51 = vpop.eup %1392  ;;  %853 = vst [vmem:[%s190_s6 + $0x8] sm:$0xff] %v1391_v50 }
 0x636   : > { %852 = vst [vmem:[%s190_s6] sm:$0xff] %v1393_v51 }
 0x638   : > { %v1395_v52 = vpop.eup %1394 }
 0x639   : > { %v1397_v53 = vpop.eup %1396  ;;  %855 = vst [vmem:[%s190_s6 + $0x18] sm:$0xff] %v1395_v52 }
 0x63a   : > { %854 = vst [vmem:[%s190_s6 + $0x10] sm:$0xff] %v1397_v53 }
 0x63b PF: > { %s13_s12 = sadd.s32 1, %s1404_s12  }
 0x63c   : > { %p10_p4 = scmp.ge.s32.totalorder %s13_s12, 6  }
 0x63e   :  { %12 = sbr.rel (!%p10_p4) target bundleno = 1 (0x1), region = 65 }

</bundles_post_ra>
